<compile_context>
chip_gen: v5e
topology: v5e:2x2
jax: 0.10.0
libtpu: 0.0.40
codegen_flags: <defaults>
</compile_context>

<pallas_src>
import functools

import jax
import jax.numpy as jnp
from jax import lax
from jax.experimental import pallas as pl
from jax.experimental.pallas import tpu as pltpu

EPS = 1e-5          # nn.BatchNorm1d default eps
NEG_SLOPE = 0.1     # nn.LeakyReLU(negative_slope=0.1)
LANE = 128


# ----------------------------- kernel helpers ------------------------------

def _conv3_fused(x, w_cat, mask_prev, mask_next):
    """k=3, pad=1 conv.  x: (Cin, Tp), w_cat: (Cout, 3*Cin) -> (Cout, Tp).

    Time shifts via XLU roll; wrapped/out-of-range columns zeroed by masks so
    the zero-padded 'same' conv is exact even though Tp >= T (lane padding).
    """
    tp = x.shape[-1]
    x_prev = pltpu.roll(x, 1, 1) * mask_prev        # col t holds x[:, t-1]; col 0 -> 0
    x_next = pltpu.roll(x, tp - 1, 1) * mask_next   # col t holds x[:, t+1]; cols >= T-1 -> 0
    x_cat = jnp.concatenate([x_prev, x, x_next], axis=0)          # (3*Cin, Tp)
    return jnp.dot(w_cat, x_cat, preferred_element_type=jnp.float32)


# --------------------------------- kernel ----------------------------------

def _resnet_kernel(num_blocks, batch_block, t_valid,
                   x_ref, a_ref, c_ref,
                   w0_ref, w3_ref, b4_ref,
                   t1w_ref, t1b_ref, t2w_ref, t2b_ref,
                   out_ref):
    tp = x_ref.shape[-1]
    lane = lax.broadcasted_iota(jnp.int32, (1, tp), 1)
    mask_prev = (lane != 0).astype(jnp.float32)           # zero the left zero-pad column
    mask_next = (lane < t_valid - 1).astype(jnp.float32)  # zero right pad + lane padding

    for b in range(batch_block):                          # small static unroll over batch block
        x = x_ref[b]                                      # (C_in, Tp)
        for r in range(num_blocks):                       # static unroll over residual blocks
            # conv_0 (1x1, no bias) with norm_1 folded into the weight
            z = jnp.dot(w0_ref[r], x, preferred_element_type=jnp.float32)   # (C_aff, Tp)
            # folded (norm_1 bias + conditioning affine): a*z + c, precomputed per (n, r)
            z = a_ref[b, r] * z + c_ref[b, r]
            # act_2: SiLU
            z = z * jax.nn.sigmoid(z)
            # conv_3 (k=3, pad=1, no bias) with norm_4 folded in; residual add
            x = x + _conv3_fused(z, w3_ref[r], mask_prev, mask_next) + b4_ref[r]

        # top: Conv1d(k=3) -> LeakyReLU(0.1) -> Conv1d(k=3)
        t = _conv3_fused(x, t1w_ref[...], mask_prev, mask_next) + t1b_ref[...]
        t = jnp.where(t >= 0, t, NEG_SLOPE * t)
        out = _conv3_fused(t, t2w_ref[...], mask_prev, mask_next) + t2b_ref[...]
        out_ref[b] = out.astype(out_ref.dtype)


# -------------------------------- wrapper -----------------------------------

def _pick_batch_block(n, max_nb=8):
    """Largest Nb <= max_nb dividing n while keeping grid >= 2 (v7x megacore)."""
    nb = 1
    for cand in range(1, min(n, max_nb) + 1):
        if n % cand == 0 and n // cand >= 2:
            nb = cand
    return nb


def _fold_params(params, cond):
    """Fold eval-mode BatchNorms + conditioning into conv weights/biases (XLA side)."""
    # norm_1 folded into conv_0
    scale1 = params["g1"] * lax.rsqrt(params["rv1"] + EPS)            # (R, C_aff, 1)
    w0f = params["w0"] * scale1                                        # (R, C_aff, C_in)
    bias1 = (params["b1"] - params["rm1"] * scale1)[..., 0]            # (R, C_aff)

    # conditioning a, b for the whole batch (one einsum each), combined with bias1:
    #   res = a * (W0' x + bias1) + b = a * (W0' x) + (a*bias1 + b)
    a_full = jnp.einsum("roc,nc->nro", params["aw"], cond) + params["ab"][None, ..., 0]
    b_full = jnp.einsum("roc,nc->nro", params["bw"], cond) + params["bb"][None, ..., 0]
    c_full = a_full * bias1[None] + b_full                             # (N, R, C_aff)

    # norm_4 (affine=False) folded into conv_3; 3 taps pre-concatenated along K
    scale4 = lax.rsqrt(params["rv4"] + EPS)                            # (R, C_in, 1)
    w3f = params["w3"] * scale4[:, None, :, :]                         # (R, 3, C_in, C_aff)
    w3cat = jnp.concatenate([w3f[:, 0], w3f[:, 1], w3f[:, 2]], axis=-1)  # (R, C_in, 3*C_aff)
    bias4 = -params["rm4"] * scale4                                    # (R, C_in, 1)

    t1w_cat = jnp.concatenate(
        [params["t1w"][0], params["t1w"][1], params["t1w"][2]], axis=-1)  # (C_in, 3*C_in)
    t2w_cat = jnp.concatenate(
        [params["t2w"][0], params["t2w"][1], params["t2w"][2]], axis=-1)  # (C_out, 3*C_in)

    return (a_full[..., None], c_full[..., None], w0f, w3cat, bias4,
            t1w_cat, params["t1b"], t2w_cat, params["t2b"])


def conditional_resnet1d(x, cond, params):
    N, C_in, T = x.shape
    R = params["w0"].shape[0]
    C_aff = params["w0"].shape[1]
    C_out = params["t2w"].shape[1]

    (a_in, c_in, w0f, w3cat, bias4,
     t1w_cat, t1b, t2w_cat, t2b) = _fold_params(params, cond)

    # Pad T to a lane-dense multiple of 128 (edge masks keep conv semantics exact).
    Tp = max(LANE, -(-T // LANE) * LANE)
    x_p = jnp.pad(x, ((0, 0), (0, 0), (0, Tp - T))) if Tp != T else x

    Nb = _pick_batch_block(N)
    grid = (N // Nb,)

    def full_spec(arr):
        nd = arr.ndim
        return pl.BlockSpec(arr.shape, lambda g, _nd=nd: (0,) * _nd)

    in_specs = [
        pl.BlockSpec((Nb, C_in, Tp), lambda g: (g, 0, 0)),          # x
        pl.BlockSpec((Nb, R, C_aff, 1), lambda g: (g, 0, 0, 0)),    # a (per batch)
        pl.BlockSpec((Nb, R, C_aff, 1), lambda g: (g, 0, 0, 0)),    # c (per batch)
        full_spec(w0f), full_spec(w3cat), full_spec(bias4),
        full_spec(t1w_cat), full_spec(t1b), full_spec(t2w_cat), full_spec(t2b),
    ]
    out_spec = pl.BlockSpec((Nb, C_out, Tp), lambda g: (g, 0, 0))

    kernel = functools.partial(_resnet_kernel, R, Nb, T)
    out_p = pl.pallas_call(
        kernel,
        out_shape=jax.ShapeDtypeStruct((N, C_out, Tp), x.dtype),
        grid_spec=pltpu.PrefetchScalarGridSpec(
            num_scalar_prefetch=0,
            grid=grid,
            in_specs=in_specs,
            out_specs=out_spec,
        ),
        compiler_params=pltpu.CompilerParams(
            dimension_semantics=("parallel",),
            vmem_limit_bytes=64 * 1024 * 1024,
        ),
    )(x_p, a_in, c_in, w0f, w3cat, bias4, t1w_cat, t1b, t2w_cat, t2b)
    return out_p[:, :, :T]


# ----------------------------- pure-JAX reference ---------------------------

def reference_forward(x, cond, params):
    def conv1d(xx, w_oik, pad):
        return lax.conv_general_dilated(
            xx, w_oik, window_strides=(1,), padding=((pad, pad),),
            dimension_numbers=("NCH", "OIH", "NCH"))

    R = params["w0"].shape[0]
    for r in range(R):
        res = conv1d(x, params["w0"][r][:, :, None], 0)
        res = ((res - params["rm1"][r][None]) * params["g1"][r][None]
               / jnp.sqrt(params["rv1"][r][None] + EPS) + params["b1"][r][None])
        a = jnp.einsum("oc,nc->no", params["aw"][r], cond)[:, :, None] + params["ab"][r][None]
        b = jnp.einsum("oc,nc->no", params["bw"][r], cond)[:, :, None] + params["bb"][r][None]
        res = a * res + b
        res = res * jax.nn.sigmoid(res)
        w3 = jnp.transpose(params["w3"][r], (1, 2, 0))    # (C_in, C_aff, 3)
        res = conv1d(res, w3, 1)
        res = (res - params["rm4"][r][None]) / jnp.sqrt(params["rv4"][r][None] + EPS)
        x = x + res

    t = conv1d(x, jnp.transpose(params["t1w"], (1, 2, 0)), 1) + params["t1b"][None]
    t = jnp.where(t >= 0, t, NEG_SLOPE * t)
    out = conv1d(t, jnp.transpose(params["t2w"], (1, 2, 0)), 1) + params["t2b"][None]
    return out


# ---------------------------------- main -------------------------------------

def _make_params(key, C_in, C_cond, C_aff, C_out, R):
    keys = iter(jax.random.split(key, 32))

    def rnd(shape, scale=0.3):
        return jax.random.normal(next(keys), shape, dtype=jnp.float32) * scale

    return {
        # per-block parameters (leading dim = R), kernel-friendly layouts
        "w0":  rnd((R, C_aff, C_in)),                        # conv_0.weight (k=1 squeezed)
        "g1":  1.0 + rnd((R, C_aff, 1), 0.1),                # norm_1.weight
        "b1":  rnd((R, C_aff, 1), 0.1),                      # norm_1.bias
        "rm1": rnd((R, C_aff, 1), 0.1),                      # norm_1.running_mean
        "rv1": 1.0 + jax.random.uniform(next(keys), (R, C_aff, 1),
                                        minval=-0.3, maxval=0.3),
        "aw":  rnd((R, C_aff, C_cond)),                      # a.weight (k=1 squeezed)
        "ab":  1.0 + rnd((R, C_aff, 1), 0.1),                # a.bias
        "bw":  rnd((R, C_aff, C_cond)),                      # b.weight
        "bb":  rnd((R, C_aff, 1), 0.1),                      # b.bias
        "w3":  rnd((R, 3, C_in, C_aff)),                     # conv_3.weight, (K,O,I) layout
        "rm4": rnd((R, C_in, 1), 0.1),                       # norm_4.running_mean
        "rv4": 1.0 + jax.random.uniform(next(keys), (R, C_in, 1),
                                        minval=-0.3, maxval=0.3),
        # top stack
        "t1w": rnd((3, C_in, C_in)),
        "t1b": rnd((C_in, 1), 0.1),
        "t2w": rnd((3, C_out, C_in)),
        "t2b": rnd((C_out, 1), 0.1),
    }


def _check(key, N, C_in, C_cond, C_aff, C_out, T, R):
    kp, kx, kc = jax.random.split(key, 3)
    params = _make_params(kp, C_in, C_cond, C_aff, C_out, R)
    x = jax.random.normal(kx, (N, C_in, T), dtype=jnp.float32)
    cond = jax.random.normal(kc, (N, C_cond), dtype=jnp.float32)

    out = jax.block_until_ready(conditional_resnet1d(x, cond, params))
    ref = reference_forward(x, cond, params)

    assert out.shape == (N, C_out, T), out.shape
    max_err = float(jnp.max(jnp.abs(out - ref)))
    assert jnp.allclose(out, ref, rtol=1e-4, atol=1e-4), max_err


if __name__ == "__main__":
    root = jax.random.PRNGKey(0)
    k1, k2 = jax.random.split(root)
    # small config consistent with the module
    _check(k1, N=2, C_in=8, C_cond=6, C_aff=16, C_out=4, T=16, R=2)
    # exercises batch blocking (Nb=2), non-multiple-of-128 T padding, R=3
    _check(k2, N=4, C_in=8, C_cond=4, C_aff=16, C_out=8, T=40, R=3)
    print("KERNEL_OK")
</pallas_src>

<mosaic_0001>
module attributes {stable_mosaic.version = 11 : i64} {
  func.func @_resnet_kernel(%arg0: i32, %arg1: memref<1x8x128xf32, #tpu.memory_space<vmem>>, %arg2: memref<1x2x16x1xf32, #tpu.memory_space<vmem>>, %arg3: memref<1x2x16x1xf32, #tpu.memory_space<vmem>>, %arg4: memref<2x16x8xf32, #tpu.memory_space<vmem>>, %arg5: memref<2x8x48xf32, #tpu.memory_space<vmem>>, %arg6: memref<2x8x1xf32, #tpu.memory_space<vmem>>, %arg7: memref<8x24xf32, #tpu.memory_space<vmem>>, %arg8: memref<8x1xf32, #tpu.memory_space<vmem>>, %arg9: memref<4x24xf32, #tpu.memory_space<vmem>>, %arg10: memref<4x1xf32, #tpu.memory_space<vmem>>, %arg11: memref<1x4x128xf32, #tpu.memory_space<vmem>>) attributes {dimension_semantics = [#tpu.dimension_semantics<parallel>], iteration_bounds = array<i64: 2>, scalar_prefetch = 0 : i64, scratch_operands = 0 : i64, tpu.core_type = #tpu.core_type<tc>, window_params = [{transform_indices = @transform_0, window_bounds = array<i64: 1, 8, 128>}, {transform_indices = @transform_1, window_bounds = array<i64: 1, 2, 16, 1>}, {transform_indices = @transform_2, window_bounds = array<i64: 1, 2, 16, 1>}, {pipeline_mode = #tpu.pipeline_mode<synchronous>, transform_indices = @transform_3, window_bounds = array<i64: 2, 16, 8>}, {pipeline_mode = #tpu.pipeline_mode<synchronous>, transform_indices = @transform_4, window_bounds = array<i64: 2, 8, 48>}, {pipeline_mode = #tpu.pipeline_mode<synchronous>, transform_indices = @transform_5, window_bounds = array<i64: 2, 8, 1>}, {pipeline_mode = #tpu.pipeline_mode<synchronous>, transform_indices = @transform_6, window_bounds = array<i64: 8, 24>}, {pipeline_mode = #tpu.pipeline_mode<synchronous>, transform_indices = @transform_7, window_bounds = array<i64: 8, 1>}, {pipeline_mode = #tpu.pipeline_mode<synchronous>, transform_indices = @transform_8, window_bounds = array<i64: 4, 24>}, {pipeline_mode = #tpu.pipeline_mode<synchronous>, transform_indices = @transform_9, window_bounds = array<i64: 4, 1>}, {transform_indices = @transform_10, window_bounds = array<i64: 1, 4, 128>}]} {
    %0 = tpu.iota {dimensions = array<i32: 1>} : vector<1x128xi32>
    %c0_i32 = arith.constant 0 : i32
    %1 = vector.broadcast %c0_i32 : i32 to vector<1x128xi32>
    %2 = arith.cmpi ne, %0, %1 : vector<1x128xi32>
    %3 = arith.extui %2 : vector<1x128xi1> to vector<1x128xi32>
    %4 = arith.sitofp %3 : vector<1x128xi32> to vector<1x128xf32>
    %c15_i32 = arith.constant 15 : i32
    %5 = vector.broadcast %c15_i32 : i32 to vector<1x128xi32>
    %6 = arith.cmpi slt, %0, %5 : vector<1x128xi32>
    %7 = arith.extui %6 : vector<1x128xi1> to vector<1x128xi32>
    %8 = arith.sitofp %7 : vector<1x128xi32> to vector<1x128xf32>
    %c0 = arith.constant 0 : index
    %c0_0 = arith.constant 0 : index
    %c0_1 = arith.constant 0 : index
    %9 = vector.load %arg1[%c0, %c0_0, %c0_1] : memref<1x8x128xf32, #tpu.memory_space<vmem>>, vector<1x8x128xf32>
    %10 = vector.shape_cast %9 : vector<1x8x128xf32> to vector<8x128xf32>
    %c0_2 = arith.constant 0 : index
    %c0_3 = arith.constant 0 : index
    %c0_4 = arith.constant 0 : index
    %11 = vector.load %arg4[%c0_2, %c0_3, %c0_4] : memref<2x16x8xf32, #tpu.memory_space<vmem>>, vector<1x16x8xf32>
    %12 = vector.shape_cast %11 : vector<1x16x8xf32> to vector<16x8xf32>
    %cst = arith.constant dense<0.000000e+00> : vector<16x128xf32>
    %13 = tpu.matmul %12, %10, %cst {dimension_numbers = #tpu.dot_dimension_numbers<[1], [0], [0], [1], [0, 0, 1, 1], [], []>} : vector<16x8xf32>, vector<8x128xf32>, vector<16x128xf32> -> vector<16x128xf32>
    %c0_5 = arith.constant 0 : index
    %c0_6 = arith.constant 0 : index
    %c0_7 = arith.constant 0 : index
    %c0_8 = arith.constant 0 : index
    %14 = vector.load %arg2[%c0_5, %c0_6, %c0_7, %c0_8] : memref<1x2x16x1xf32, #tpu.memory_space<vmem>>, vector<1x1x16x1xf32>
    %15 = vector.shape_cast %14 : vector<1x1x16x1xf32> to vector<16x1xf32>
    %16 = vector.broadcast %15 : vector<16x1xf32> to vector<16x128xf32>
    %17 = arith.mulf %16, %13 : vector<16x128xf32>
    %c0_9 = arith.constant 0 : index
    %c0_10 = arith.constant 0 : index
    %c0_11 = arith.constant 0 : index
    %c0_12 = arith.constant 0 : index
    %18 = vector.load %arg3[%c0_9, %c0_10, %c0_11, %c0_12] : memref<1x2x16x1xf32, #tpu.memory_space<vmem>>, vector<1x1x16x1xf32>
    %19 = vector.shape_cast %18 : vector<1x1x16x1xf32> to vector<16x1xf32>
    %20 = vector.broadcast %19 : vector<16x1xf32> to vector<16x128xf32>
    %21 = arith.addf %17, %20 : vector<16x128xf32>
    %22 = arith.negf %21 : vector<16x128xf32>
    %23 = math.exp %22 : vector<16x128xf32>
    %cst_13 = arith.constant 1.000000e+00 : f32
    %24 = vector.broadcast %cst_13 : f32 to vector<16x128xf32>
    %25 = arith.addf %24, %23 : vector<16x128xf32>
    %26 = arith.divf %24, %25 : vector<16x128xf32>
    %27 = arith.mulf %21, %26 : vector<16x128xf32>
    %c0_14 = arith.constant 0 : index
    %c0_15 = arith.constant 0 : index
    %c0_16 = arith.constant 0 : index
    %28 = vector.load %arg5[%c0_14, %c0_15, %c0_16] : memref<2x8x48xf32, #tpu.memory_space<vmem>>, vector<1x8x48xf32>
    %29 = vector.shape_cast %28 : vector<1x8x48xf32> to vector<8x48xf32>
    %c1_i32 = arith.constant 1 : i32
    %30 = tpu.dynamic_rotate %27 by %c1_i32 dim 1 : vector<16x128xf32>, i32 -> vector<16x128xf32>
    %31 = vector.broadcast %4 : vector<1x128xf32> to vector<16x128xf32>
    %32 = arith.mulf %30, %31 : vector<16x128xf32>
    %c127_i32 = arith.constant 127 : i32
    %33 = tpu.dynamic_rotate %27 by %c127_i32 dim 1 : vector<16x128xf32>, i32 -> vector<16x128xf32>
    %34 = vector.broadcast %8 : vector<1x128xf32> to vector<16x128xf32>
    %35 = arith.mulf %33, %34 : vector<16x128xf32>
    %36 = tpu.concatenate %32, %27, %35 in 0 : vector<16x128xf32>, vector<16x128xf32>, vector<16x128xf32> -> vector<48x128xf32>
    %cst_17 = arith.constant dense<0.000000e+00> : vector<8x128xf32>
    %37 = tpu.matmul %29, %36, %cst_17 {dimension_numbers = #tpu.dot_dimension_numbers<[1], [0], [0], [1], [0, 0, 1, 1], [], []>} : vector<8x48xf32>, vector<48x128xf32>, vector<8x128xf32> -> vector<8x128xf32>
    %38 = arith.addf %10, %37 : vector<8x128xf32>
    %c0_18 = arith.constant 0 : index
    %c0_19 = arith.constant 0 : index
    %c0_20 = arith.constant 0 : index
    %39 = vector.load %arg6[%c0_18, %c0_19, %c0_20] : memref<2x8x1xf32, #tpu.memory_space<vmem>>, vector<1x8x1xf32>
    %40 = vector.shape_cast %39 : vector<1x8x1xf32> to vector<8x1xf32>
    %41 = vector.broadcast %40 : vector<8x1xf32> to vector<8x128xf32>
    %42 = arith.addf %38, %41 : vector<8x128xf32>
    %c1 = arith.constant 1 : index
    %c0_21 = arith.constant 0 : index
    %c0_22 = arith.constant 0 : index
    %43 = vector.load %arg4[%c1, %c0_21, %c0_22] : memref<2x16x8xf32, #tpu.memory_space<vmem>>, vector<1x16x8xf32>
    %44 = vector.shape_cast %43 : vector<1x16x8xf32> to vector<16x8xf32>
    %cst_23 = arith.constant dense<0.000000e+00> : vector<16x128xf32>
    %45 = tpu.matmul %44, %42, %cst_23 {dimension_numbers = #tpu.dot_dimension_numbers<[1], [0], [0], [1], [0, 0, 1, 1], [], []>} : vector<16x8xf32>, vector<8x128xf32>, vector<16x128xf32> -> vector<16x128xf32>
    %c0_24 = arith.constant 0 : index
    %c1_25 = arith.constant 1 : index
    %c0_26 = arith.constant 0 : index
    %c0_27 = arith.constant 0 : index
    %46 = vector.load %arg2[%c0_24, %c1_25, %c0_26, %c0_27] : memref<1x2x16x1xf32, #tpu.memory_space<vmem>>, vector<1x1x16x1xf32>
    %47 = vector.shape_cast %46 : vector<1x1x16x1xf32> to vector<16x1xf32>
    %48 = vector.broadcast %47 : vector<16x1xf32> to vector<16x128xf32>
    %49 = arith.mulf %48, %45 : vector<16x128xf32>
    %c0_28 = arith.constant 0 : index
    %c1_29 = arith.constant 1 : index
    %c0_30 = arith.constant 0 : index
    %c0_31 = arith.constant 0 : index
    %50 = vector.load %arg3[%c0_28, %c1_29, %c0_30, %c0_31] : memref<1x2x16x1xf32, #tpu.memory_space<vmem>>, vector<1x1x16x1xf32>
    %51 = vector.shape_cast %50 : vector<1x1x16x1xf32> to vector<16x1xf32>
    %52 = vector.broadcast %51 : vector<16x1xf32> to vector<16x128xf32>
    %53 = arith.addf %49, %52 : vector<16x128xf32>
    %54 = arith.negf %53 : vector<16x128xf32>
    %55 = math.exp %54 : vector<16x128xf32>
    %cst_32 = arith.constant 1.000000e+00 : f32
    %56 = vector.broadcast %cst_32 : f32 to vector<16x128xf32>
    %57 = arith.addf %56, %55 : vector<16x128xf32>
    %58 = arith.divf %56, %57 : vector<16x128xf32>
    %59 = arith.mulf %53, %58 : vector<16x128xf32>
    %c1_33 = arith.constant 1 : index
    %c0_34 = arith.constant 0 : index
    %c0_35 = arith.constant 0 : index
    %60 = vector.load %arg5[%c1_33, %c0_34, %c0_35] : memref<2x8x48xf32, #tpu.memory_space<vmem>>, vector<1x8x48xf32>
    %61 = vector.shape_cast %60 : vector<1x8x48xf32> to vector<8x48xf32>
    %c1_i32_36 = arith.constant 1 : i32
    %62 = tpu.dynamic_rotate %59 by %c1_i32_36 dim 1 : vector<16x128xf32>, i32 -> vector<16x128xf32>
    %63 = vector.broadcast %4 : vector<1x128xf32> to vector<16x128xf32>
    %64 = arith.mulf %62, %63 : vector<16x128xf32>
    %c127_i32_37 = arith.constant 127 : i32
    %65 = tpu.dynamic_rotate %59 by %c127_i32_37 dim 1 : vector<16x128xf32>, i32 -> vector<16x128xf32>
    %66 = vector.broadcast %8 : vector<1x128xf32> to vector<16x128xf32>
    %67 = arith.mulf %65, %66 : vector<16x128xf32>
    %68 = tpu.concatenate %64, %59, %67 in 0 : vector<16x128xf32>, vector<16x128xf32>, vector<16x128xf32> -> vector<48x128xf32>
    %cst_38 = arith.constant dense<0.000000e+00> : vector<8x128xf32>
    %69 = tpu.matmul %61, %68, %cst_38 {dimension_numbers = #tpu.dot_dimension_numbers<[1], [0], [0], [1], [0, 0, 1, 1], [], []>} : vector<8x48xf32>, vector<48x128xf32>, vector<8x128xf32> -> vector<8x128xf32>
    %70 = arith.addf %42, %69 : vector<8x128xf32>
    %c1_39 = arith.constant 1 : index
    %c0_40 = arith.constant 0 : index
    %c0_41 = arith.constant 0 : index
    %71 = vector.load %arg6[%c1_39, %c0_40, %c0_41] : memref<2x8x1xf32, #tpu.memory_space<vmem>>, vector<1x8x1xf32>
    %72 = vector.shape_cast %71 : vector<1x8x1xf32> to vector<8x1xf32>
    %73 = vector.broadcast %72 : vector<8x1xf32> to vector<8x128xf32>
    %74 = arith.addf %70, %73 : vector<8x128xf32>
    %c0_42 = arith.constant 0 : index
    %c0_43 = arith.constant 0 : index
    %75 = vector.load %arg7[%c0_42, %c0_43] : memref<8x24xf32, #tpu.memory_space<vmem>>, vector<8x24xf32>
    %c1_i32_44 = arith.constant 1 : i32
    %76 = tpu.dynamic_rotate %74 by %c1_i32_44 dim 1 : vector<8x128xf32>, i32 -> vector<8x128xf32>
    %77 = vector.broadcast %4 : vector<1x128xf32> to vector<8x128xf32>
    %78 = arith.mulf %76, %77 : vector<8x128xf32>
    %c127_i32_45 = arith.constant 127 : i32
    %79 = tpu.dynamic_rotate %74 by %c127_i32_45 dim 1 : vector<8x128xf32>, i32 -> vector<8x128xf32>
    %80 = vector.broadcast %8 : vector<1x128xf32> to vector<8x128xf32>
    %81 = arith.mulf %79, %80 : vector<8x128xf32>
    %82 = tpu.concatenate %78, %74, %81 in 0 : vector<8x128xf32>, vector<8x128xf32>, vector<8x128xf32> -> vector<24x128xf32>
    %cst_46 = arith.constant dense<0.000000e+00> : vector<8x128xf32>
    %83 = tpu.matmul %75, %82, %cst_46 {dimension_numbers = #tpu.dot_dimension_numbers<[1], [0], [0], [1], [0, 0, 1, 1], [], []>} : vector<8x24xf32>, vector<24x128xf32>, vector<8x128xf32> -> vector<8x128xf32>
    %c0_47 = arith.constant 0 : index
    %c0_48 = arith.constant 0 : index
    %84 = vector.load %arg8[%c0_47, %c0_48] : memref<8x1xf32, #tpu.memory_space<vmem>>, vector<8x1xf32>
    %85 = vector.broadcast %84 : vector<8x1xf32> to vector<8x128xf32>
    %86 = arith.addf %83, %85 : vector<8x128xf32>
    %cst_49 = arith.constant 0.000000e+00 : f32
    %87 = vector.broadcast %cst_49 : f32 to vector<8x128xf32>
    %88 = arith.cmpf oge, %86, %87 : vector<8x128xf32>
    %cst_50 = arith.constant 1.000000e-01 : f32
    %89 = vector.broadcast %cst_50 : f32 to vector<8x128xf32>
    %90 = arith.mulf %89, %86 : vector<8x128xf32>
    %91 = arith.select %88, %86, %90 : vector<8x128xi1>, vector<8x128xf32>
    %c0_51 = arith.constant 0 : index
    %c0_52 = arith.constant 0 : index
    %92 = vector.load %arg9[%c0_51, %c0_52] : memref<4x24xf32, #tpu.memory_space<vmem>>, vector<4x24xf32>
    %c1_i32_53 = arith.constant 1 : i32
    %93 = tpu.dynamic_rotate %91 by %c1_i32_53 dim 1 : vector<8x128xf32>, i32 -> vector<8x128xf32>
    %94 = vector.broadcast %4 : vector<1x128xf32> to vector<8x128xf32>
    %95 = arith.mulf %93, %94 : vector<8x128xf32>
    %c127_i32_54 = arith.constant 127 : i32
    %96 = tpu.dynamic_rotate %91 by %c127_i32_54 dim 1 : vector<8x128xf32>, i32 -> vector<8x128xf32>
    %97 = vector.broadcast %8 : vector<1x128xf32> to vector<8x128xf32>
    %98 = arith.mulf %96, %97 : vector<8x128xf32>
    %99 = tpu.concatenate %95, %91, %98 in 0 : vector<8x128xf32>, vector<8x128xf32>, vector<8x128xf32> -> vector<24x128xf32>
    %cst_55 = arith.constant dense<0.000000e+00> : vector<4x128xf32>
    %100 = tpu.matmul %92, %99, %cst_55 {dimension_numbers = #tpu.dot_dimension_numbers<[1], [0], [0], [1], [0, 0, 1, 1], [], []>} : vector<4x24xf32>, vector<24x128xf32>, vector<4x128xf32> -> vector<4x128xf32>
    %c0_56 = arith.constant 0 : index
    %c0_57 = arith.constant 0 : index
    %101 = vector.load %arg10[%c0_56, %c0_57] : memref<4x1xf32, #tpu.memory_space<vmem>>, vector<4x1xf32>
    %102 = vector.broadcast %101 : vector<4x1xf32> to vector<4x128xf32>
    %103 = arith.addf %100, %102 : vector<4x128xf32>
    %c0_58 = arith.constant 0 : index
    %c0_59 = arith.constant 0 : index
    %c0_60 = arith.constant 0 : index
    %104 = vector.load %arg11[%c0_58, %c0_59, %c0_60] : memref<1x4x128xf32, #tpu.memory_space<vmem>>, vector<1x4x128xf32>
    %105 = vector.shape_cast %104 : vector<1x4x128xf32> to vector<4x128xf32>
    %106 = vector.shape_cast %103 : vector<4x128xf32> to vector<1x4x128xf32>
    tpu.vector_store %arg11[%c0_58, %c0_59, %c0_60], %106 {strides = array<i32>} : memref<1x4x128xf32, #tpu.memory_space<vmem>>, vector<1x4x128xf32>,
    return
  }
  func.func @transform_0(%arg0: i32) -> (i32, i32, i32) {
    %c0_i32 = arith.constant 0 : i32
    %c0_i32_0 = arith.constant 0 : i32
    %c0_i32_1 = arith.constant 0 : i32
    return %arg0, %c0_i32, %c0_i32_0 : i32, i32, i32
  }
  func.func @transform_1(%arg0: i32) -> (i32, i32, i32, i32) {
    %c0_i32 = arith.constant 0 : i32
    %c0_i32_0 = arith.constant 0 : i32
    %c0_i32_1 = arith.constant 0 : i32
    %c0_i32_2 = arith.constant 0 : i32
    return %arg0, %c0_i32, %c0_i32_0, %c0_i32_1 : i32, i32, i32, i32
  }
  func.func @transform_2(%arg0: i32) -> (i32, i32, i32, i32) {
    %c0_i32 = arith.constant 0 : i32
    %c0_i32_0 = arith.constant 0 : i32
    %c0_i32_1 = arith.constant 0 : i32
    %c0_i32_2 = arith.constant 0 : i32
    return %arg0, %c0_i32, %c0_i32_0, %c0_i32_1 : i32, i32, i32, i32
  }
  func.func @transform_3(%arg0: i32) -> (i32, i32, i32) {
    %c0_i32 = arith.constant 0 : i32
    %c0_i32_0 = arith.constant 0 : i32
    %c0_i32_1 = arith.constant 0 : i32
    %c0_i32_2 = arith.constant 0 : i32
    return %c0_i32, %c0_i32_0, %c0_i32_1 : i32, i32, i32
  }
  func.func @transform_4(%arg0: i32) -> (i32, i32, i32) {
    %c0_i32 = arith.constant 0 : i32
    %c0_i32_0 = arith.constant 0 : i32
    %c0_i32_1 = arith.constant 0 : i32
    %c0_i32_2 = arith.constant 0 : i32
    return %c0_i32, %c0_i32_0, %c0_i32_1 : i32, i32, i32
  }
  func.func @transform_5(%arg0: i32) -> (i32, i32, i32) {
    %c0_i32 = arith.constant 0 : i32
    %c0_i32_0 = arith.constant 0 : i32
    %c0_i32_1 = arith.constant 0 : i32
    %c0_i32_2 = arith.constant 0 : i32
    return %c0_i32, %c0_i32_0, %c0_i32_1 : i32, i32, i32
  }
  func.func @transform_6(%arg0: i32) -> (i32, i32) {
    %c0_i32 = arith.constant 0 : i32
    %c0_i32_0 = arith.constant 0 : i32
    %c0_i32_1 = arith.constant 0 : i32
    return %c0_i32, %c0_i32_0 : i32, i32
  }
  func.func @transform_7(%arg0: i32) -> (i32, i32) {
    %c0_i32 = arith.constant 0 : i32
    %c0_i32_0 = arith.constant 0 : i32
    %c0_i32_1 = arith.constant 0 : i32
    return %c0_i32, %c0_i32_0 : i32, i32
  }
  func.func @transform_8(%arg0: i32) -> (i32, i32) {
    %c0_i32 = arith.constant 0 : i32
    %c0_i32_0 = arith.constant 0 : i32
    %c0_i32_1 = arith.constant 0 : i32
    return %c0_i32, %c0_i32_0 : i32, i32
  }
  func.func @transform_9(%arg0: i32) -> (i32, i32) {
    %c0_i32 = arith.constant 0 : i32
    %c0_i32_0 = arith.constant 0 : i32
    %c0_i32_1 = arith.constant 0 : i32
    return %c0_i32, %c0_i32_0 : i32, i32
  }
  func.func @transform_10(%arg0: i32) -> (i32, i32, i32) {
    %c0_i32 = arith.constant 0 : i32
    %c0_i32_0 = arith.constant 0 : i32
    %c0_i32_1 = arith.constant 0 : i32
    return %arg0, %c0_i32, %c0_i32_0 : i32, i32, i32
  }
}

</mosaic_0001>

<bundles_post_ra>
// kernel: tpu_custom_call.1
= control target key start
LH: loop header
LB: loop body
LE: loop exit
PB: predicated region body
PF: predicated region fallthrough
CT: control target
= control target key end

     0   :  { %s1281_s0 = inlined_call_operand.vmem [shape: f32[2,8,128], index: 0, kind: input, shape index: {}]   ;;  %s1282_s1 = inlined_call_operand.vmem [shape: f32[2,2,16,1], index: 1, kind: input, shape index: {}]   ;;  %s1283_s2 = inlined_call_operand.vmem [shape: f32[2,2,16,1], index: 2, kind: input, shape index: {}]   ;;  %s1284_s3 = inlined_call_operand.vmem [shape: f32[2,16,8], index: 3, kind: input, shape index: {}]   ;;  %s1285_s4 = inlined_call_operand.vmem [shape: f32[2,8,48], index: 4, kind: input, shape index: {}]   ;;  %s1286_s5 = inlined_call_operand.vmem [shape: f32[2,8,1], index: 5, kind: input, shape index: {}]   ;;  %s1287_s6 = inlined_call_operand.vmem [shape: f32[8,24], index: 6, kind: input, shape index: {}]   ;;  %s1288_s7 = inlined_call_operand.vmem [shape: f32[8,1], index: 7, kind: input, shape index: {}]   ;;  %s1289_s8 = inlined_call_operand.vmem [shape: f32[4,24], index: 8, kind: input, shape index: {}]   ;;  %s1290_s9 = inlined_call_operand.vmem [shape: f32[4,1], index: 9, kind: input, shape index: {}]   ;;  %s1291_s10 = inlined_call_operand.hbm [shape: f32[2,4,128], index: 10, kind: output, shape index: {}]  }
   0x1   :  { %1292 = sst [smem:[#allocation6_spill]] %s1283_s2 }
   0x2   :  { %15 = vsyncpa [#allocation3], 0 }
   0x3   :  { %17 = vsyncpa [#allocation3 + $0x1], 0  ;;  %s1097_s13 = smov 0   ;;  %s1099_s14 = smov 0  }
   0x4   :  { %s1101_s15 = smov 0   ;;  %s1103_s16 = smov 0  }
   0x5 LB: > { %s1118_s17 = sadd.s32 4294967295, %s1036_s16   ;;  %s873_s18 = sadd.s32 4294967294, %s1036_s16   ;;  %s1036_s16 = sphi %s1103_s16, %s1301_s16   ;;  %s1032_s15 = sphi %s1101_s15, %s1300_s15   ;;  %s1028_s14 = sphi %s1099_s14, %s1299_s14   ;;  %s1024_s13 = sphi %s1097_s13, %s1298_s13  }
   0x6   : > { %s1122_s19 = sadd.s32 1, %s1036_s16   ;;  %s255_s20 = sadd.s32 1, %s1032_s15 }
   0x7   : > { %s252_s21 = ssub.s32 %s1036_s16, %s1122_s19  ;;  %p265_p0 = scmp.ne.s32.totalorder %s1032_s15, %s1028_s14 }
   0x8   : > { %p253_p1 = scmp.eq.s32.totalorder %s252_s21, 0  ;;  %p266_p2 = scmp.eq.s32.totalorder %s1118_s17, 1 }
   0x9   : > { %p271_p3 = scmp.ne.s32.totalorder %s1028_s14, %s1024_s13  ;;  %p272_p4 = scmp.eq.s32.totalorder %s873_s18, 1 }
   0xa   : > { %s1133_s22 = scalar_select %p253_p1, %s1032_s15, %s255_s20  }
   0xb   : > { %p1135_p5 = por %p266_p2, %p265_p0  ;;  %p1139_p6 = por %p272_p4, %p271_p3 }
   0xc   : > { %1293 = sst [smem:[#allocation5_spill]] %s1133_s22  ;;  %p876_p7 = scmp.ge.s32.totalorder %s1036_s16, 1 }
   0xd   : > { %p334_p8 = scmp.lt.s32.totalorder %s1036_s16, 3 }
   0xf   : > { %p335_p9 = pnand %p876_p7, %p334_p8 }
  0x10   : > { %p381_p10 = scmp.lt.s32.totalorder (!%p335_p9), %s1118_s17, 1  ;;  %s1296_s2 = sld [smem:[#allocation6_spill]] (!%p335_p9) }
  0x11   : > { %338 = sbr.rel (%p335_p9) target bundleno = 1392 (0x570), region = 60  ;;  %s1040_s22 = smov (!%p335_p9), 127  }
  0x16   : > { %v1038_v0 = vmov 0   ;;  %s382_s25 = scalar_select %p381_p10, %s1118_s17, 1  ;;  %v404_v1 = vld [vmem:[%s1284_s3] sm:$0xff]  ;;  %vm406_vm0 = vcmask 64512   ;;  %v405_v4 = vld [vmem:[%s1284_s3 + $0x8] sm:$0xff]  ;;  %v395_v49 = vlaneseq  ;;  %v1041_v51 = vmov 0.0  }
  0x17   : > { %956 = vset.pattern.permute.xlu1 %v1038_v0  ;;  %955 = vset.pattern.permute.xlu0 %v1038_v0  ;;  %v542_v56 = vld [vmem:[%s1286_s5] sm:$0xff]  ;;  %vm517_vm11 = vcmask 392192  }
  0x18   : > { %957 = vset.pattern.permute.xlu2 %v1038_v0  ;;  %s909_s26 = sshll.u32 %s382_s25, 5  ;;  %s878_s27 = sshll.u32 %s382_s25, 3  ;;  %v396_v50 = vand.u32 127, %v395_v49  ;;  %v504_v0 = vld [vmem:[%s1285_s4] sm:$0xff] }
  0x19   : > { %s1150_s30 = scalar_lea.vmem %s1296_s2, %s909_s26  ;;  %s1155_s18 = scalar_lea.vmem %s1282_s1, %s909_s26 }
  0x1a   : > { %v451_v2 = vld [vmem:[%s1150_s30 + $0x8] sm:$0xff]  ;;  %s384_s28 = scalar_lea.vmem %s1281_s0, %s878_s27  ;;  %v450_v6 = vld [vmem:[%s1150_s30] sm:$0xff]  ;;  %s1039_s2 = smov 1   ;;  %v894_v46 = vld [vmem:[%s1155_s18 + $0x10] sm:$0xff]  ;;  %vm400_vm9 = vcmp.lt.s32.totalorder %v396_v50, 15  ;;  %vm397_vm10 = vcmp.ne.s32.totalorder %v396_v50, 0 }
  0x1b   : > { %v437_v3 = vld [vmem:[%s1155_s18 + $0x8] sm:$0xff]  ;;  %459 = vperm.xlu1 %956, %v451_v2   ;;  %v1168_v5 = vld [vmem:[%s384_s28] sm:$0xff]  ;;  %v895_v47 = vld [vmem:[%s1155_s18 + $0x18] sm:$0xff]  ;;  %v1183_v52 = vsel %vm400_vm9, 1.0, %v1041_v51  ;;  %v1191_v59 = vsel %vm397_vm10, 1.0, %v1041_v51  ;;  %s378_s28 = sand.u32 1, %s1028_s14  }
  0x1c   : > { %445 = vperm.xlu0 %955, %v437_v3   ;;  %428 = vmatpush.msra.mxu0 %v1168_v5  ;;  %v436_v7 = vld [vmem:[%s1155_s18] sm:$0xff]  ;;  %v896_v48 = vld [vmem:[%s1150_s30 + $0x10] sm:$0xff]  ;;  %v897_v58 = vld [vmem:[%s1150_s30 + $0x18] sm:$0xff]  ;;  %s877_s29 = sshll.u32 %s378_s28, 2  ;;  %s775_s18 = scalar_lea.sflag [#allocation3], %s378_s28 }
  0x1d   : > { %911 = vmatpush.msra.mxu1 %v1168_v5  ;;  %885 = vmatmul.msk.f32.vlgmr.msra.gmra.mxu0 %vm406_vm0, %v404_v1  ;;  %s380_s11 = scalar_lea.vmem [#allocation2], %s877_s29  ;;  %s994_s29 = scalar_lea.hbm %s1291_s10, 8 }
  0x1e   : > { %886 = vmatmul.msk.f32.vlgmr.msra.gmra.mxu1 %vm406_vm0, %v405_v4  ;;  %s787_s12 = sshll.u32 %s380_s11, 4  ;;  %s788_s12 = int_to_ptr.vmem [resolvable:$true] %s787_s12 }
  0x23   : > { %454 = vperm.xlu1 %956, %v450_v6   ;;  %v890_v6 = vld [vmem:[%s1284_s3 + $0x10] sm:$0xff] }
  0x24   : > { %440 = vperm.xlu0 %955, %v436_v7   ;;  %v891_v7 = vld [vmem:[%s1284_s3 + $0x18] sm:$0xff] }
  0x8d   : > { %v460_v9 = vpop.permute.xlu1 %459 }
  0x8e   : > { %v446_v8 = vpop.permute.xlu0 %445 }
  0x95   : > { %v455_v15 = vpop.permute.xlu1 %454 }
  0x96   : > { %v441_v10 = vpop.permute.xlu0 %440 }
  0x9a   : > { %v430_v11 = vpop.f32.mrf.mxu0 }
  0x9b   : > { %v433_v12 = vpop.f32.mrf.mxu1  ;;  %v448_v13 = vmul.f32 %v441_v10, %v430_v11 }
  0x9c   : > { %v449_v14 = vmul.f32 %v446_v8, %v433_v12 }
  0x9d   : > { %v462_v16 = vadd.f32 %v455_v15, %v448_v13 }
  0x9e   : > { %v463_v17 = vadd.f32 %v460_v9, %v449_v14 }
  0x9f   : > { %v887_v18 = vmul.f32 -1.442695, %v462_v16 }
  0xa0   : > { %v888_v19 = vmul.f32 -1.442695, %v463_v17 }
  0xa1   : > { %958 = vpow2.f32 %v887_v18 }
  0xa2   : > { %960 = vpow2.f32 %v888_v19 }
  0xa7   : > { %v959_v20 = vpop.eup %958 }
  0xa8   : > { %v961_v21 = vpop.eup %960  ;;  %v470_v22 = vadd.f32 1.0, %v959_v20 }
  0xa9   : > { %v471_v23 = vadd.f32 1.0, %v961_v21 }
  0xaa   : > { %962 = vrcp.f32 %v470_v22  ;;  %v483_v30 = vand.u32 2147483648, %v470_v22  ;;  %v481_v33 = vand.u32 2147483647, %v470_v22  ;;  %vm477_vm3 = vweird.f32 %v470_v22 }
  0xab   : > { %964 = vrcp.f32 %v471_v23  ;;  %v498_v31 = vand.u32 2147483648, %v471_v23  ;;  %v496_v35 = vand.u32 2147483647, %v471_v23  ;;  %vm492_vm4 = vweird.f32 %v471_v23 }
  0xac   : > { %v484_v38 = vor.u32 1.1754944e-38, %v483_v30  ;;  %vm482_vm7 = vcmp.eq.f32.partialorder %v481_v33, 8.507059e+37 }
  0xad   : > { %v499_v39 = vor.u32 1.1754944e-38, %v498_v31  ;;  %vm497_vm8 = vcmp.eq.f32.partialorder %v496_v35, 8.507059e+37 }
  0xb0   : > { %v963_v24 = vpop.eup %962 }
  0xb1   : > { %v965_v25 = vpop.eup %964  ;;  %v473_v26 = vmul.f32 %v963_v24, %v470_v22  ;;  %vm478_vm1 = vweird.f32 %v963_v24 }
  0xb2   : > { %v488_v27 = vmul.f32 %v965_v25, %v471_v23  ;;  %vm493_vm2 = vweird.f32 %v965_v25  ;;  %vm479_vm5 = vmor %vm477_vm3, %vm478_vm1 }
  0xb3   : > { %v474_v28 = vsub.f32 1.0, %v473_v26  ;;  %vm494_vm6 = vmor %vm492_vm4, %vm493_vm2  ;;  %vm710_vm4 = vcmask 195584  }
  0xb4   : > { %v489_v29 = vsub.f32 1.0, %v488_v27 }
  0xb5   : > { %v475_v32 = vmul.f32 %v963_v24, %v474_v28 }
  0xb6   : > { %v490_v34 = vmul.f32 %v965_v25, %v489_v29 }
  0xb7   : > { %v476_v36 = vadd.f32 %v963_v24, %v475_v32 }
  0xb8   : > { %v491_v37 = vadd.f32 %v965_v25, %v490_v34 }
  0xb9   : > { %v480_v40 = vsel %vm479_vm5, %v963_v24, %v476_v36 }
  0xba   : > { %v495_v41 = vsel %vm494_vm6, %v965_v25, %v491_v37  ;;  %v485_v42 = vsel %vm482_vm7, %v484_v38, %v480_v40 }
  0xbb   : > { %v500_v43 = vsel %vm497_vm8, %v499_v39, %v495_v41  ;;  %v502_v44 = vmul.f32 %v485_v42, %v462_v16 }
  0xbc   : > { %v503_v45 = vmul.f32 %v500_v43, %v463_v17  ;;  %v902_v43 = vld [vmem:[%s1286_s5 + $0x8] sm:$0xff] }
  0xbd   : > { %505 = vrot.lane.b32.xlu1 %v502_v44, %s1039_s2 }
  0xbe   : > { %507 = vrot.lane.b32.xlu0 %v503_v45, %s1039_s2  ;;  %513 = vrot.lane.b32.xlu2 %v503_v45, %s1040_s22 }
  0xc5   : > { %586 = vperm.xlu1 %956, %v894_v46   ;;  %v704_v46 = vld [vmem:[%s1288_s7] sm:$0xff] }
  0xc6   : > { %591 = vperm.xlu0 %955, %v895_v47   ;;  %511 = vrot.lane.b32.xlu2 %v502_v44, %s1040_s22  ;;  %v744_v47 = vld [vmem:[%s1290_s9] sm:$0xf] }
  0xce   : > { %601 = vperm.xlu0 %955, %v896_v48   ;;  %545 = vperm.xlu2 %957, %v542_v56  }
  0xd6   : > { %606 = vperm.xlu2 %957, %v897_v58  }
 0x118   : > { %v514_v53 = vpop.permute.xlu2 %513 }
 0x119   : > { %v516_v54 = vmul.f32 %v1183_v52, %v514_v53 }
 0x11b   : > { %531 = vmatpush.msrb.mxu1 %v516_v54 }
 0x120   : > { %v512_v55 = vpop.permute.xlu2 %511 }
 0x121   : > { %v515_v57 = vmul.f32 %v1183_v52, %v512_v55 }
 0x123   : > { %532 = vmatpush.msrb.mxu1 %v515_v57  ;;  %v900_v57 = vld [vmem:[%s1285_s4 + $0x8] sm:$0xff] }
 0x125   : > { %533 = vmatpush.msrb.mxu1 %v503_v45 }
 0x127   : > { %534 = vmatpush.msrb.mxu1 %v502_v44 }
 0x128   : > { %v546_v3 = vpop.permute.xlu2 %545 }
 0x12f   : > { %v506_v61 = vpop.permute.xlu1 %505 }
 0x130   : > { %v508_v60 = vpop.permute.xlu0 %507  ;;  %v509_v63 = vmul.f32 %v1191_v59, %v506_v61  ;;  %v607_v16 = vpop.permute.xlu2 %606 }
 0x131   : > { %v510_v62 = vmul.f32 %v1191_v59, %v508_v60 }
 0x133   : > { %535 = vmatpush.msrb.mxu1 %v510_v62 }
 0x135   : > { %536 = vmatpush.msrb.mxu1 %v509_v63 }
 0x136   : > { %889 = vmatmul.msk.f32.vlgmr.msrb.gmra.mxu1 %vm517_vm11, %v504_v0 }
 0x137   : > { %v587_v9 = vpop.permute.xlu1 %586 }
 0x138   : > { %v592_v8 = vpop.permute.xlu0 %591 }
 0x140   : > { %v602_v11 = vpop.permute.xlu0 %601 }
 0x1b3   : > { %v538_v1 = vpop.f32.mrf.mxu1 }
 0x1b4   : > { %v541_v2 = vadd.f32 %v538_v1, %v1168_v5 }
 0x1b6   : > { %v1200_v4 = vadd.f32 %v546_v3, %v541_v2  ;;  %v697_v3 = vld [vmem:[%s1287_s6] sm:$0xff] }
 0x1b8   : > { %573 = vmatpush.msra.mxu2 %v1200_v4 }
 0x1b9   : > { %892 = vmatmul.msk.f32.vlgmr.msra.gmra.mxu2 %vm406_vm0, %v890_v6 }
 0x1c1   : > { %893 = vmatmul.msk.f32.gmra.mxu2 %vm406_vm0, %v891_v7 }
 0x23c   : > { %v575_v5 = vpop.f32.mrf.mxu2 }
 0x23d   : > { %v594_v10 = vmul.f32 %v587_v9, %v575_v5 }
 0x23f   : > { %v609_v12 = vadd.f32 %v602_v11, %v594_v10 }
 0x241   : > { %v898_v13 = vmul.f32 -1.442695, %v609_v12 }
 0x243   : > { %966 = vpow2.f32 %v898_v13  ;;  %v737_v13 = vld [vmem:[%s1289_s8] sm:$0xf] }
 0x244   : > { %v578_v14 = vpop.f32.mrf.mxu2 }
 0x245   : > { %v595_v15 = vmul.f32 %v592_v8, %v578_v14 }
 0x247   : > { %v610_v17 = vadd.f32 %v607_v16, %v595_v15 }
 0x249   : > { %v967_v18 = vpop.eup %966  ;;  %v899_v19 = vmul.f32 -1.442695, %v610_v17 }
 0x24a   : > { %v617_v20 = vadd.f32 1.0, %v967_v18 }
 0x24b   : > { %968 = vpow2.f32 %v899_v19 }
 0x24c   : > { %970 = vrcp.f32 %v617_v20  ;;  %v630_v26 = vand.u32 2147483648, %v617_v20  ;;  %v628_v28 = vand.u32 2147483647, %v617_v20  ;;  %vm624_vm13 = vweird.f32 %v617_v20 }
 0x24e   : > { %v631_v31 = vor.u32 1.1754944e-38, %v630_v26  ;;  %vm629_vm15 = vcmp.eq.f32.partialorder %v628_v28, 8.507059e+37 }
 0x251   : > { %v969_v21 = vpop.eup %968 }
 0x252   : > { %v971_v22 = vpop.eup %970  ;;  %v618_v23 = vadd.f32 1.0, %v969_v21 }
 0x253   : > { %v620_v24 = vmul.f32 %v971_v22, %v617_v20  ;;  %vm625_vm12 = vweird.f32 %v971_v22 }
 0x254   : > { %972 = vrcp.f32 %v618_v23  ;;  %vm626_vm14 = vmor %vm624_vm13, %vm625_vm12  ;;  %v645_v37 = vand.u32 2147483648, %v618_v23  ;;  %v643_v39 = vand.u32 2147483647, %v618_v23  ;;  %vm639_vm1 = vweird.f32 %v618_v23 }
 0x255   : > { %v621_v25 = vsub.f32 1.0, %v620_v24 }
 0x256   : > { %v646_v41 = vor.u32 1.1754944e-38, %v645_v37  ;;  %vm644_vm3 = vcmp.eq.f32.partialorder %v643_v39, 8.507059e+37 }
 0x257   : > { %v622_v27 = vmul.f32 %v971_v22, %v621_v25 }
 0x259   : > { %v623_v29 = vadd.f32 %v971_v22, %v622_v27 }
 0x25a   : > { %v973_v30 = vpop.eup %972 }
 0x25b   : > { %v627_v32 = vsel %vm626_vm14, %v971_v22, %v623_v29  ;;  %v635_v33 = vmul.f32 %v973_v30, %v618_v23  ;;  %vm640_vm0 = vweird.f32 %v973_v30 }
 0x25c   : > { %v632_v34 = vsel %vm629_vm15, %v631_v31, %v627_v32  ;;  %vm641_vm2 = vmor %vm639_vm1, %vm640_vm0 }
 0x25d   : > { %v649_v35 = vmul.f32 %v632_v34, %v609_v12  ;;  %v636_v36 = vsub.f32 1.0, %v635_v33 }
 0x25f   : > { %659 = vrot.lane.b32.xlu2 %v649_v35, %s1040_s22  ;;  %v637_v38 = vmul.f32 %v973_v30, %v636_v36 }
 0x261   : > { %v638_v40 = vadd.f32 %v973_v30, %v637_v38 }
 0x263   : > { %v642_v42 = vsel %vm641_vm2, %v973_v30, %v638_v40 }
 0x264   : > { %v647_v44 = vsel %vm644_vm3, %v646_v41, %v642_v42 }
 0x265   : > { %v650_v45 = vmul.f32 %v647_v44, %v610_v17 }
 0x267   : > { %693 = vperm.xlu2 %957, %v902_v43   ;;  %655 = vrot.lane.b32.xlu0 %v650_v45, %s1039_s2 }
 0x268   : > { %661 = vrot.lane.b32.xlu1 %v650_v45, %s1040_s22 }
 0x26f   : > { %707 = vperm.xlu2 %957, %v704_v46  }
 0x270   : > { %653 = vrot.lane.b32.xlu1 %v649_v35, %s1039_s2 }
 0x277   : > { %747 = vperm.xlu2 %957, %v744_v47  }
 0x2b9   : > { %v660_v48 = vpop.permute.xlu2 %659 }
 0x2ba   : > { %v663_v51 = vmul.f32 %v1183_v52, %v660_v48 }
 0x2c1   : > { %v694_v61 = vpop.permute.xlu2 %693 }
 0x2d9   : > { %v656_v53 = vpop.permute.xlu0 %655 }
 0x2da   : > { %v662_v49 = vpop.permute.xlu1 %661  ;;  %v658_v55 = vmul.f32 %v1191_v59, %v656_v53 }
 0x2db   : > { %v664_v50 = vmul.f32 %v1183_v52, %v662_v49 }
 0x2dd   : > { %678 = vmatpush.msra.mxu3 %v664_v50 }
 0x2df   : > { %679 = vmatpush.msra.mxu3 %v663_v51 }
 0x2e1   : > { %680 = vmatpush.msra.mxu3 %v650_v45 }
 0x2e2   : > { %v654_v54 = vpop.permute.xlu1 %653 }
 0x2e3   : > { %681 = vmatpush.msra.mxu3 %v649_v35  ;;  %v657_v56 = vmul.f32 %v1191_v59, %v654_v54 }
 0x2e5   : > { %682 = vmatpush.msra.mxu3 %v658_v55 }
 0x2e7   : > { %683 = vmatpush.msra.mxu3 %v657_v56 }
 0x2e8   : > { %901 = vmatmul.msk.f32.vlgmr.msra.gmra.mxu3 %vm517_vm11, %v900_v57 }
 0x36b   : > { %v685_v58 = vpop.f32.mrf.mxu3 }
 0x36c   : > { %v688_v60 = vadd.f32 %v685_v58, %v1200_v4  ;;  %v708_v4 = vpop.permute.xlu2 %707 }
 0x36e   : > { %v696_v62 = vadd.f32 %v694_v61, %v688_v60 }
 0x370   : > { %698 = vrot.lane.b32.xlu1 %v696_v62, %s1039_s2  ;;  %701 = vrot.lane.b32.xlu0 %v696_v62, %s1040_s22 }
 0x3e2   : > { %v702_v63 = vpop.permute.xlu0 %701  ;;  %v699_v1 = vpop.permute.xlu1 %698 }
 0x3e3   : > { %v703_v0 = vmul.f32 %v1183_v52, %v702_v63  ;;  %v700_v2 = vmul.f32 %v1191_v59, %v699_v1 }
 0x3e5   : > { %727 = vmatpush.msrb.mxu0 %v703_v0 }
 0x3e7   : > { %728 = vmatpush.msrb.mxu0 %v696_v62 }
 0x3e9   : > { %729 = vmatpush.msrb.mxu0 %v700_v2 }
 0x3ea   : > { %903 = vmatmul.msk.f32.vlgmr.msrb.gmra.mxu0 %vm710_vm4, %v697_v3 }
 0x467   : > { %v731_v6 = vpop.f32.mrf.mxu0 }
 0x468   : > { %v732_v7 = vadd.f32 %v731_v6, %v708_v4 }
 0x46a   : > { %v735_v8 = vmul.f32 0.1, %v732_v7  ;;  %vm734_vm5 = vcmp.ge.f32.partialorder %v732_v7, 0.0 }
 0x46c   : > { %v736_v9 = vsel %vm734_vm5, %v732_v7, %v735_v8 }
 0x46d   : > { %738 = vrot.lane.b32.xlu1 %v736_v9, %s1039_s2  ;;  %741 = vrot.lane.b32.xlu0 %v736_v9, %s1040_s22  ;;  %s906_s2 = sshll.u32 %s1118_s17, 2 }
 0x46e   : > { %s785_s27 = scalar_lea.hbm %s1291_s10, %s906_s2 }
 0x46f   : > { %s789_s30 = sshll.u32 %s785_s27, 4  ;;  %s790_s30 = int_to_ptr.hbm [resolvable:$true] %s789_s30 }
 0x470   : > { %s988_s20 = sshra.s32 %s790_s30, 4  ;;  %s989_s20 = int_to_ptr.hbm [resolvable:$true] %s988_s20 }
 0x471   : > { %s990_s21 = scalar_lea.hbm %s989_s20, 4  ;;  %p995_p0 = scmp.lt.s32.totalorder %s989_s20, %s1291_s10 }
 0x472   : > { %p991_p11 = scmp.ne.s32.totalorder %s989_s20, %s990_s21  ;;  %p996_p1 = scmp.lt.s32.totalorder %s994_s29, %s990_s21 }
 0x474   : > { %p992_p12 = pnand %p991_p11, %p1135_p5  ;;  %p997_p2 = por %p996_p1, %p995_p0 }
 0x476   : > { %p993_p13 = pneg %p992_p12 }
 0x478   : > { %p998_p3 = pnand %p997_p2, %p993_p13 }
 0x4df   : > { %v742_v5 = vpop.permute.xlu0 %741  ;;  %v739_v11 = vpop.permute.xlu1 %738 }
 0x4e0   : > { %v743_v10 = vmul.f32 %v1183_v52, %v742_v5  ;;  %v740_v12 = vmul.f32 %v1191_v59, %v739_v11  ;;  %v748_v52 = vpop.permute.xlu2 %747 }
 0x4e2   : > { %766 = vmatpush.msrb.mxu2 %v743_v10 }
 0x4e4   : > { %767 = vmatpush.msrb.mxu2 %v736_v9 }
 0x4e6   : > { %768 = vmatpush.msrb.mxu2 %v740_v12 }
 0x4e7   : > { %904 = vmatmul.msk.f32.vlgmr.msrb.gmra.mxu2 %vm710_vm4, %v737_v13 }
 0x56a   : > { %v770_v59 = vpop.f32.mrf.mxu2 }
 0x56b   : > { %v771_v14 = vadd.f32 %v770_v59, %v748_v52 }
 0x56d   : > { %773 = vst [vmem:[%s380_s11] sm:$0xf] %v771_v14 }
 0x56e   : > { %1001 = shalt.err (!%p998_p3)
}
 0x56f   : > { %912 = dma.vmem_to_hbm [thread:$0]  (%p1135_p5), %s788_s12, 64, %s790_s30, %s775_s18  }
 0x570 PF: > { %p918_p4 = scmp.ge.s32.totalorder %s1036_s16, 2  ;;  %s801_s28 = sand.u32 1, %s1024_s13  }
 0x571   : > { %s802_s22 = scalar_lea.sflag [#allocation3], %s801_s28 }
 0x572   : > { %p915_p7 = pnand %p918_p4, %p1139_p6 }
 0x574   : > { %p916_p8 = pneg %p915_p7 }
 0x576   : > { %1019 = dma.done.wait (%p916_p8), %s802_s22, 64  }
 0x577   : > { %1021 = vsyncadd (%p916_p8), %s802_s22, 4294967232  ;;  %s1297_s27 = sld [smem:[#allocation5_spill]]  ;;  %p20_p9 = scmp.ge.s32.totalorder %s1122_s19, 4  }
 0x578   : > { %s1298_s13 = smov %s1028_s14  ;;  %s1299_s14 = smov %s1032_s15 }
 0x579   : > { %s1301_s16 = smov %s1122_s19  ;;  %22 = sbr.rel (!%p20_p9) target bundleno = 5 (0x5), region = 106 }
 0x57d   : > { %s1300_s15 = smov %s1297_s27 }
 0x57e   :  { %808 = vsyncpa [#allocation3], 1 }
 0x57f   :  { %810 = vsyncpa [#allocation3 + $0x1], 1 }

</bundles_post_ra>
